<compile_context>
chip_gen: v5e
topology: v5e:2x2
jax: 0.10.0
libtpu: 0.0.40
codegen_flags: <defaults>
</compile_context>

<pallas_src>
import jax
import jax.numpy as jnp
from jax.experimental import pallas as pl
from jax.experimental.pallas import tpu as pltpu


def _attention_kernel(x_ref, w_ref, wseq_ref, probs_ref):
    # x_ref block:    (TB, T, F)
    # w_ref block:    (1, 1, F)    (lane-aligned broadcast form of attention_weight)
    # wseq_ref block: (TB, F)
    # probs_ref block:(TB, T)
    x = x_ref[...].astype(jnp.float32)        # (TB, T, F)  f32 compute (v5e-safe)
    w = w_ref[...].astype(jnp.float32)        # (1, 1, F)   broadcasts over TB, T

    # scores kept in x's layout: (TB, T, 1)  (T on sublanes, lane dim size 1).
    scores = jnp.sum(x * w, axis=-1, keepdims=True)       # (TB, T, 1)

    # Numerically-stable softmax over the time axis (axis=1 here).
    m = jnp.max(scores, axis=1, keepdims=True)             # (TB, 1, 1)
    e = jnp.exp(scores - m)                                # (TB, T, 1) unnormalized
    denom = jnp.sum(e, axis=1, keepdims=True)              # (TB, 1, 1)
    inv = 1.0 / denom                                      # (TB, 1, 1)

    # weighted = sum_T (e * x): e broadcasts along lanes with stride 0 (no
    # relayout), reduction over the sublane (T) axis.
    weighted = jnp.sum(x * e, axis=1)                      # (TB, F)

    wseq_ref[...] = (weighted * inv[:, 0, :]).astype(wseq_ref.dtype)      # (TB, F)
    probs_ref[...] = ((e * inv)[:, :, 0]).astype(probs_ref.dtype)         # (TB, T)


def _round_up(x, m):
    return ((x + m - 1) // m) * m


def attention_forward(x, attention_weight):
    """x: (B, T, F), attention_weight: (F, 1).

    Returns (weighted_sequence (B, F), attention_probs (B, T)), both in x.dtype.
    """
    B, T, F = x.shape
    assert attention_weight.shape == (F, 1)

    # Lane-aligned broadcast form of the weight: (1, 1, F).
    w = attention_weight.reshape(1, 1, F)

    itemsize = jnp.dtype(x.dtype).itemsize
    # Layout-padded extents (sublanes -> 8, lanes -> 128).
    Tp = _round_up(T, 8)
    Fp = _round_up(F, 128)
    Tp_lane = _round_up(T, 128)   # T is the lane dim of the probs output block

    # Per-batch-row VMEM cost of one grid step:
    #   2x double-buffered x input tile (x.dtype, padded layout)
    #   ~3x f32 working copies (widened x, x*w, x*e)
    #   2x double-buffered outputs (wseq + probs, padded layout)
    row_bytes = (
        2 * Tp * Fp * itemsize        # input DMA buffers
        + 3 * Tp * Fp * 4             # f32 intermediates
        + 2 * (Fp + Tp_lane) * itemsize  # output buffers
    )

    # Per-generation VMEM budget.
    try:
        vmem_cap = int(pltpu.get_tpu_info().vmem_capacity_bytes)
    except Exception:
        vmem_cap = 64 << 20
    if vmem_cap >= (96 << 20):
        budget = 56 << 20            # v5e / v6e: 128 MiB physical VMEM
    else:
        budget = 28 << 20            # v7x: 64 MiB physical / 32 MiB default-scoped
    slack = 2 << 20

    # --- Choose TB: batch rows per grid step (always a multiple of 8). ---
    tb_budget = max(8, ((budget - slack) // max(row_bytes, 1)) // 8 * 8)
    B8 = _round_up(B, 8)             # minimal zero-padded batch
    tb = min(tb_budget, B8)
    tb = max(8, (tb // 8) * 8)
    # Guarantee >= 2 grid steps when the batch allows (feeds both v7x TCs).
    if B8 >= 16 and tb >= B8:
        tb = max(8, _round_up((B + 1) // 2, 8))

    n_blocks = pl.cdiv(B, tb)
    Bp = n_blocks * tb
    if Bp != B:
        # Zero-padded rows: softmax of zeros is finite/uniform; sliced off below.
        x = jnp.pad(x, ((0, Bp - B), (0, 0), (0, 0)))

    # Scoped-VMEM request: the per-generation budget always covers the tile we
    # just sized; if even TB=8 overflows it (huge T*F), request the footprint.
    vmem_limit = int(max(budget, min(vmem_cap - (4 << 20), tb * row_bytes + slack)))

    out_shapes = (
        jax.ShapeDtypeStruct((Bp, F), x.dtype),    # weighted_sequence
        jax.ShapeDtypeStruct((Bp, T), x.dtype),    # attention_probs
    )

    wseq, probs = pl.pallas_call(
        _attention_kernel,
        out_shape=out_shapes,
        grid_spec=pltpu.PrefetchScalarGridSpec(
            num_scalar_prefetch=0,
            grid=(n_blocks,),
            in_specs=[
                pl.BlockSpec((tb, T, F), lambda b: (b, 0, 0)),
                pl.BlockSpec((1, 1, F), lambda b: (0, 0, 0)),
            ],
            out_specs=[
                pl.BlockSpec((tb, F), lambda b: (b, 0)),
                pl.BlockSpec((tb, T), lambda b: (b, 0)),
            ],
        ),
        compiler_params=pltpu.CompilerParams(
            dimension_semantics=("parallel",),
            vmem_limit_bytes=vmem_limit,
        ),
    )(x, w)

    return wseq[:B], probs[:B]


def attention_reference(x, attention_weight):
    scores = jnp.squeeze(jnp.matmul(x, attention_weight), axis=2)   # (B, T)
    probs = jax.nn.softmax(scores, axis=1)                          # (B, T)
    weighted = jnp.einsum("btf,bt->bf", x, probs)                   # (B, F)
    return weighted, probs


if __name__ == "__main__":
    B, T, F = 2, 8, 32  # batch, seq_len, feature_dim

    key = jax.random.PRNGKey(0)
    kx, kw = jax.random.split(key)
    x = jax.random.normal(kx, (B, T, F), dtype=jnp.float32)
    # Deterministic "parameter" init for attention_weight (feature_dim, 1).
    attention_weight = jax.random.normal(kw, (F, 1), dtype=jnp.float32) * 0.1

    wseq, probs = attention_forward(x, attention_weight)
    jax.block_until_ready((wseq, probs))

    ref_wseq, ref_probs = attention_reference(x, attention_weight)
    assert wseq.shape == (B, F) and probs.shape == (B, T)
    assert jnp.allclose(wseq, ref_wseq, atol=1e-5, rtol=1e-5), "weighted mismatch"
    assert jnp.allclose(probs, ref_probs, atol=1e-5, rtol=1e-5), "probs mismatch"
    assert jnp.allclose(jnp.sum(probs, axis=1), 1.0, atol=1e-5), "probs not normalized"

    print("KERNEL_OK")
</pallas_src>

<mosaic_0001>
module attributes {stable_mosaic.version = 11 : i64} {
  func.func @_attention_kernel(%arg0: i32, %arg1: memref<8x8x32xf32, #tpu.memory_space<vmem>>, %arg2: memref<1x1x32xf32, #tpu.memory_space<vmem>>, %arg3: memref<8x32xf32, #tpu.memory_space<vmem>>, %arg4: memref<8x8xf32, #tpu.memory_space<vmem>>) attributes {dimension_semantics = [#tpu.dimension_semantics<parallel>], iteration_bounds = array<i64: 1>, scalar_prefetch = 0 : i64, scratch_operands = 0 : i64, tpu.core_type = #tpu.core_type<tc>, window_params = [{transform_indices = @transform_0, window_bounds = array<i64: 8, 8, 32>}, {pipeline_mode = #tpu.pipeline_mode<synchronous>, transform_indices = @transform_1, window_bounds = array<i64: 1, 1, 32>}, {transform_indices = @transform_2, window_bounds = array<i64: 8, 32>}, {transform_indices = @transform_3, window_bounds = array<i64: 8, 8>}]} {
    %c0 = arith.constant 0 : index
    %c0_0 = arith.constant 0 : index
    %c0_1 = arith.constant 0 : index
    %0 = vector.load %arg1[%c0, %c0_0, %c0_1] : memref<8x8x32xf32, #tpu.memory_space<vmem>>, vector<8x8x32xf32>
    %c0_2 = arith.constant 0 : index
    %c0_3 = arith.constant 0 : index
    %c0_4 = arith.constant 0 : index
    %1 = vector.load %arg2[%c0_2, %c0_3, %c0_4] : memref<1x1x32xf32, #tpu.memory_space<vmem>>, vector<1x1x32xf32>
    %2 = vector.broadcast %1 : vector<1x1x32xf32> to vector<8x8x32xf32>
    %3 = arith.mulf %0, %2 : vector<8x8x32xf32>
    %cst = arith.constant dense<0.000000e+00> : vector<8x8xf32>
    %4 = vector.multi_reduction <add>, %3, %cst [2] : vector<8x8x32xf32> to vector<8x8xf32>
    %5 = vector.shape_cast %4 : vector<8x8xf32> to vector<8x8x1xf32>
    %cst_5 = arith.constant dense<0xFF800000> : vector<8x1xf32>
    %6 = vector.multi_reduction <maximumf>, %5, %cst_5 [1] : vector<8x8x1xf32> to vector<8x1xf32>
    %7 = vector.shape_cast %6 : vector<8x1xf32> to vector<8x1x1xf32>
    %8 = vector.broadcast %7 : vector<8x1x1xf32> to vector<8x8x1xf32>
    %9 = arith.subf %5, %8 : vector<8x8x1xf32>
    %10 = math.exp %9 : vector<8x8x1xf32>
    %cst_6 = arith.constant dense<0.000000e+00> : vector<8x1xf32>
    %11 = vector.multi_reduction <add>, %10, %cst_6 [1] : vector<8x8x1xf32> to vector<8x1xf32>
    %12 = vector.shape_cast %11 : vector<8x1xf32> to vector<8x1x1xf32>
    %cst_7 = arith.constant 1.000000e+00 : f32
    %13 = vector.broadcast %cst_7 : f32 to vector<8x1x1xf32>
    %14 = arith.divf %13, %12 : vector<8x1x1xf32>
    %15 = vector.broadcast %10 : vector<8x8x1xf32> to vector<8x8x32xf32>
    %16 = arith.mulf %0, %15 : vector<8x8x32xf32>
    %cst_8 = arith.constant dense<0.000000e+00> : vector<8x32xf32>
    %17 = vector.multi_reduction <add>, %16, %cst_8 [1] : vector<8x8x32xf32> to vector<8x32xf32>
    %18 = vector.shape_cast %14 : vector<8x1x1xf32> to vector<8x1xf32>
    %19 = vector.broadcast %18 : vector<8x1xf32> to vector<8x32xf32>
    %20 = arith.mulf %17, %19 : vector<8x32xf32>
    %c0_9 = arith.constant 0 : index
    %c0_10 = arith.constant 0 : index
    %21 = vector.load %arg3[%c0_9, %c0_10] : memref<8x32xf32, #tpu.memory_space<vmem>>, vector<8x32xf32>
    tpu.vector_store %arg3[%c0_9, %c0_10], %20 {strides = array<i32>} : memref<8x32xf32, #tpu.memory_space<vmem>>, vector<8x32xf32>,
    %22 = vector.broadcast %14 : vector<8x1x1xf32> to vector<8x8x1xf32>
    %23 = arith.mulf %10, %22 : vector<8x8x1xf32>
    %24 = vector.shape_cast %23 : vector<8x8x1xf32> to vector<8x8xf32>
    %c0_11 = arith.constant 0 : index
    %c0_12 = arith.constant 0 : index
    %25 = vector.load %arg4[%c0_11, %c0_12] : memref<8x8xf32, #tpu.memory_space<vmem>>, vector<8x8xf32>
    tpu.vector_store %arg4[%c0_11, %c0_12], %24 {strides = array<i32>} : memref<8x8xf32, #tpu.memory_space<vmem>>, vector<8x8xf32>,
    return
  }
  func.func @transform_0(%arg0: i32) -> (i32, i32, i32) {
    %c0_i32 = arith.constant 0 : i32
    %c0_i32_0 = arith.constant 0 : i32
    %c0_i32_1 = arith.constant 0 : i32
    return %arg0, %c0_i32, %c0_i32_0 : i32, i32, i32
  }
  func.func @transform_1(%arg0: i32) -> (i32, i32, i32) {
    %c0_i32 = arith.constant 0 : i32
    %c0_i32_0 = arith.constant 0 : i32
    %c0_i32_1 = arith.constant 0 : i32
    %c0_i32_2 = arith.constant 0 : i32
    return %c0_i32, %c0_i32_0, %c0_i32_1 : i32, i32, i32
  }
  func.func @transform_2(%arg0: i32) -> (i32, i32) {
    %c0_i32 = arith.constant 0 : i32
    %c0_i32_0 = arith.constant 0 : i32
    return %arg0, %c0_i32 : i32, i32
  }
  func.func @transform_3(%arg0: i32) -> (i32, i32) {
    %c0_i32 = arith.constant 0 : i32
    %c0_i32_0 = arith.constant 0 : i32
    return %arg0, %c0_i32 : i32, i32
  }
}

</mosaic_0001>

<bundles_post_ra>
// kernel: tpu_custom_call.1
= control target key start
LH: loop header
LB: loop body
LE: loop exit
PB: predicated region body
PF: predicated region fallthrough
CT: control target
= control target key end

     0   :  { %9 = vsyncpa [#allocation3], 0  ;;  %s1042_s0 = inlined_call_operand.hbm [shape: f32[8,8,32], index: 0, kind: input, shape index: {}]   ;;  %s1043_s1 = inlined_call_operand.hbm [shape: f32[1,1,32], index: 1, kind: input, shape index: {}]   ;;  %s1044_s2 = inlined_call_operand.hbm [shape: f32[8,32], index: 2, kind: output, shape index: {0}]   ;;  %s1045_s3 = inlined_call_operand.hbm [shape: f32[8,8], index: 3, kind: output, shape index: {1}]  }
   0x1   :  { %10 = vsyncpa [#allocation6], 0 }
   0x2   :  { %11 = vsyncpa [#allocation4], 0 }
   0x3   :  { %12 = vsyncpa [#allocation9], 0  ;;  %s17_s14 = sshll.u32 %s1042_s0, 4  ;;  %s639_s15 = smov [#allocation2]   ;;  %s18_s14 = int_to_ptr.hbm [resolvable:$true] %s17_s14 }
   0x4   :  { %s19_s16 = sshll.u32 %s639_s15, 4  ;;  %s31_s19 = sshll.u32 %s1043_s1, 4  ;;  %s20_s16 = int_to_ptr.vmem [resolvable:$true] %s19_s16  ;;  %s32_s19 = int_to_ptr.hbm [resolvable:$true] %s31_s19 }
   0x5   :  { %s640_s20 = smov 128   ;;  %s641_s21 = smov 8  }
   0x6   :  { %25 = dma.hbm_to_vmem [thread:$0]  %s18_s14, 1024, %s20_s16, [#allocation3], %s640_s20, %s640_s20, %s641_s21  }
   0x7   :  { %s642_s22 = smov [#allocation5]  }
   0x8   :  { %s33_s23 = sshll.u32 %s642_s22, 4  ;;  %s34_s23 = int_to_ptr.vmem [resolvable:$true] %s33_s23 }
   0x9   :  { %36 = dma.hbm_to_vmem [thread:$0]  %s32_s19, 16, %s34_s23, [#allocation6]  }
   0xa   :  { %631 = dma.done.wait [#allocation3], 1024  }
   0xb   :  { %632 = vsyncadd [#allocation3], 4294966272 }
   0xc   :  { %633 = dma.done.wait [#allocation6], 16  }
   0xd   :  { %634 = vsyncadd [#allocation6], 4294967280  ;;  %v671_v0 = vld [vmem:[#allocation2 + $0x20] sm:$0xff]  ;;  %vm65_vm0 = vcmask 261120   ;;  %v673_v2 = vld [vmem:[#allocation2 + $0x10] sm:$0xff]  ;;  %s643_s0 = smov [#allocation7]  }
   0xe   :  { %v502_v1 = vld [vmem:[#allocation5] ss:$0 sm:$0xff]  ;;  %v680_v7 = vld [vmem:[#allocation2 + $0x28] sm:$0xff]  ;;  %v682_v8 = vld [vmem:[#allocation2 + $0x18] sm:$0xff]  ;;  %s467_s1 = sshll.u32 %s643_s0, 4  ;;  %s469_s26 = sshll.u32 %s1044_s2, 4  ;;  %s468_s1 = int_to_ptr.vmem [resolvable:$true] %s467_s1  ;;  %s470_s26 = int_to_ptr.hbm [resolvable:$true] %s469_s26 }
   0xf   :  { %v675_v3 = vld [vmem:[#allocation2] sm:$0xff]  ;;  %v61_v4 = vmul.f32 %v502_v1, %v671_v0  ;;  %v59_v5 = vmul.f32 %v502_v1, %v673_v2  ;;  %v687_v12 = vld [vmem:[#allocation2 + $0x8] sm:$0xff]  ;;  %v62_v13 = vmul.f32 %v502_v1, %v680_v7  ;;  %v60_v14 = vmul.f32 %v502_v1, %v682_v8  ;;  %v695_v19 = vld [vmem:[#allocation2 + $0x38] sm:$0xff]  ;;  %s644_s2 = smov [#allocation8]   ;;  %s480_s30 = sshll.u32 %s1045_s3, 4  ;;  %s481_s30 = int_to_ptr.hbm [resolvable:$true] %s480_s30 }
  0x10   :  { %v57_v6 = vmul.f32 %v502_v1, %v675_v3  ;;  %v58_v15 = vmul.f32 %v502_v1, %v687_v12  ;;  %v697_v20 = vld [vmem:[#allocation2 + $0x30] sm:$0xff]  ;;  %v64_v21 = vmul.f32 %v502_v1, %v695_v19  ;;  %s478_s27 = sshll.u32 %s644_s2, 4  ;;  %s479_s27 = int_to_ptr.vmem [resolvable:$true] %s478_s27 }
  0x11   :  { %v78_v9 = vsel %vm65_vm0, %v61_v4, 0.0  ;;  %v72_v10 = vsel %vm65_vm0, %v59_v5, 0.0  ;;  %v81_v16 = vsel %vm65_vm0, %v62_v13, 0.0  ;;  %v75_v17 = vsel %vm65_vm0, %v60_v14, 0.0 }
  0x12   :  { %v66_v11 = vsel %vm65_vm0, %v57_v6, 0.0  ;;  %79 = vadd.xlane.f32.xlu2 %v78_v9  ;;  %73 = vadd.xlane.f32.xlu1 %v72_v10  ;;  %v69_v18 = vsel %vm65_vm0, %v58_v15, 0.0  ;;  %v63_v22 = vmul.f32 %v502_v1, %v697_v20  ;;  %v87_v23 = vsel %vm65_vm0, %v64_v21, 0.0 }
  0x13   :  { %67 = vadd.xlane.f32.xlu0 %v66_v11 }
  0x14   :  { %v84_v24 = vsel %vm65_vm0, %v63_v22, 0.0 }
  0x1a   :  { %82 = vadd.xlane.f32.xlu2 %v81_v16  ;;  %76 = vadd.xlane.f32.xlu1 %v75_v17 }
  0x1b   :  { %70 = vadd.xlane.f32.xlu0 %v69_v18 }
  0x22   :  { %88 = vadd.xlane.f32.xlu1 %v87_v23 }
  0x23   :  { %85 = vadd.xlane.f32.xlu0 %v84_v24 }
  0x85   :  { %v80_v25 = vpop.xlane.xlu2 %79  ;;  %v74_v26 = vpop.xlane.xlu1 %73 }
  0x86   :  { %v114_v27 = vrot.slane %v80_v25, 4  ;;  %v102_v28 = vrot.slane %v74_v26, 4  ;;  %v68_v29 = vpop.xlane.xlu0 %67 }
  0x87   :  { %v90_v30 = vrot.slane %v68_v29, 4 }
  0x88   :  { %v115_v31 = vmax.f32 %v80_v25, %v114_v27  ;;  %v103_v32 = vmax.f32 %v74_v26, %v102_v28 }
  0x89   :  { %v91_v33 = vmax.f32 %v68_v29, %v90_v30 }
  0x8a   :  { %v116_v34 = vrot.slane %v115_v31, 2  ;;  %v104_v35 = vrot.slane %v103_v32, 2 }
  0x8b   :  { %v92_v36 = vrot.slane %v91_v33, 2 }
  0x8c   :  { %v117_v37 = vmax.f32 %v115_v31, %v116_v34  ;;  %v105_v38 = vmax.f32 %v103_v32, %v104_v35 }
  0x8d   :  { %v93_v39 = vmax.f32 %v91_v33, %v92_v36  ;;  %v83_v40 = vpop.xlane.xlu2 %82  ;;  %v77_v41 = vpop.xlane.xlu1 %76 }
  0x8e   :  { %v118_v42 = vrot.slane %v117_v37, 1  ;;  %v106_v43 = vrot.slane %v105_v38, 1  ;;  %v120_v44 = vrot.slane %v83_v40, 4  ;;  %v108_v45 = vrot.slane %v77_v41, 4  ;;  %v71_v46 = vpop.xlane.xlu0 %70 }
  0x8f   :  { %v94_v47 = vrot.slane %v93_v39, 1  ;;  %v96_v48 = vrot.slane %v71_v46, 4 }
  0x90   :  { %v119_v49 = vmax.f32 %v117_v37, %v118_v42  ;;  %v107_v50 = vmax.f32 %v105_v38, %v106_v43  ;;  %v121_v51 = vmax.f32 %v83_v40, %v120_v44  ;;  %v109_v52 = vmax.f32 %v77_v41, %v108_v45 }
  0x91   :  { %v95_v53 = vmax.f32 %v93_v39, %v94_v47  ;;  %v97_v54 = vmax.f32 %v71_v46, %v96_v48 }
  0x92   :  { %v142_v55 = vsub.f32 %v80_v25, %v119_v49  ;;  %v140_v56 = vsub.f32 %v74_v26, %v107_v50  ;;  %v122_v57 = vrot.slane %v121_v51, 2  ;;  %v110_v58 = vrot.slane %v109_v52, 2 }
  0x93   :  { %v138_v59 = vsub.f32 %v68_v29, %v95_v53  ;;  %v98_v60 = vrot.slane %v97_v54, 2 }
  0x94   :  { %v154_v61 = vmul.f32 1.442695, %v142_v55  ;;  %v150_v62 = vmul.f32 1.442695, %v140_v56  ;;  %v123_v63 = vmax.f32 %v121_v51, %v122_v57  ;;  %v111_v1 = vmax.f32 %v109_v52, %v110_v58 }
  0x95   :  { %v146_v4 = vmul.f32 1.442695, %v138_v59  ;;  %v99_v5 = vmax.f32 %v97_v54, %v98_v60  ;;  %v89_v6 = vpop.xlane.xlu1 %88 }
  0x96   :  { %503 = vpow2.f32 %v154_v61  ;;  %v124_v9 = vrot.slane %v123_v63, 1  ;;  %v112_v10 = vrot.slane %v111_v1, 1  ;;  %v132_v11 = vrot.slane %v89_v6, 4  ;;  %v86_v13 = vpop.xlane.xlu0 %85 }
  0x97   :  { %505 = vpow2.f32 %v150_v62  ;;  %v100_v14 = vrot.slane %v99_v5, 1  ;;  %v126_v15 = vrot.slane %v86_v13, 4 }
  0x98   :  { %507 = vpow2.f32 %v146_v4  ;;  %v125_v16 = vmax.f32 %v123_v63, %v124_v9  ;;  %v113_v17 = vmax.f32 %v111_v1, %v112_v10  ;;  %v133_v18 = vmax.f32 %v89_v6, %v132_v11 }
  0x99   :  { %v101_v21 = vmax.f32 %v99_v5, %v100_v14  ;;  %v127_v22 = vmax.f32 %v86_v13, %v126_v15 }
  0x9a   :  { %v143_v23 = vsub.f32 %v83_v40, %v125_v16  ;;  %v141_v24 = vsub.f32 %v77_v41, %v113_v17  ;;  %v134_v25 = vrot.slane %v133_v18, 2 }
  0x9b   :  { %v139_v26 = vsub.f32 %v71_v46, %v101_v21  ;;  %v128_v27 = vrot.slane %v127_v22, 2 }
  0x9c   :  { %v703_v28 = vpop.eup %503  ;;  %v156_v29 = vmul.f32 1.442695, %v143_v23  ;;  %v152_v30 = vmul.f32 1.442695, %v141_v24  ;;  %v135_v31 = vmax.f32 %v133_v18, %v134_v25 }
  0x9d   :  { %v705_v32 = vpop.eup %505  ;;  %v186_v33 = vrot.slane %v703_v28, 4  ;;  %v148_v34 = vmul.f32 1.442695, %v139_v26  ;;  %v129_v35 = vmax.f32 %v127_v22, %v128_v27  ;;  %v334_v14 = vmul.f32 %v703_v28, %v671_v0 }
  0x9e   :  { %v708_v36 = vpop.eup %507  ;;  %v174_v37 = vrot.slane %v705_v32, 4  ;;  %509 = vpow2.f32 %v156_v29  ;;  %v136_v38 = vrot.slane %v135_v31, 1  ;;  %v332_v59 = vmul.f32 %v705_v32, %v673_v2 }
  0x9f   :  { %v187_v39 = vadd.f32 %v703_v28, %v186_v33  ;;  %v162_v40 = vrot.slane %v708_v36, 4  ;;  %511 = vpow2.f32 %v152_v30  ;;  %v130_v43 = vrot.slane %v129_v35, 1 }
  0xa0   :  { %v175_v41 = vadd.f32 %v705_v32, %v174_v37  ;;  %513 = vpow2.f32 %v148_v34  ;;  %v137_v42 = vmax.f32 %v135_v31, %v136_v38  ;;  %v330_v46 = vmul.f32 %v708_v36, %v675_v3 }
  0xa1   :  { %v188_v44 = vrot.slane %v187_v39, 2  ;;  %v163_v45 = vadd.f32 %v708_v36, %v162_v40  ;;  %v131_v49 = vmax.f32 %v129_v35, %v130_v43  ;;  %v740_v17 = vsel %vm65_vm0, %v332_v59, 0.0 }
  0xa2   :  { %v176_v47 = vrot.slane %v175_v41, 2  ;;  %v145_v48 = vsub.f32 %v89_v6, %v137_v42  ;;  %v338_v3 = vsel %vm65_vm0, %v330_v46, 0.0  ;;  %v353_v0 = vrot.slane %v740_v17, 4 }
  0xa3   :  { %v189_v50 = vadd.f32 %v188_v44, %v187_v39  ;;  %v164_v51 = vrot.slane %v163_v45, 2  ;;  %v144_v55 = vsub.f32 %v86_v13, %v131_v49  ;;  %v339_v16 = vrot.slane %v338_v3, 4 }
  0xa4   :  { %v717_v52 = vpop.eup %509  ;;  %v177_v53 = vadd.f32 %v176_v47, %v175_v41  ;;  %v160_v54 = vmul.f32 1.442695, %v145_v48  ;;  %v758_v33 = vsel %vm65_vm0, %v334_v14, 0.0 }
  0xa5   :  { %v719_v56 = vpop.eup %511  ;;  %v165_v57 = vadd.f32 %v164_v51, %v163_v45  ;;  %v192_v58 = vrot.slane %v717_v52, 4  ;;  %v158_v63 = vmul.f32 1.442695, %v144_v55  ;;  %v190_v6 = vrot.slane %v189_v50, 1 }
  0xa6   :  { %v725_v60 = vpop.eup %513  ;;  %v178_v61 = vrot.slane %v177_v53, 1  ;;  %v180_v62 = vrot.slane %v719_v56, 4  ;;  %515 = vpow2.f32 %v160_v54  ;;  %v753_v30 = vmul.f32 %v717_v52, %v680_v7 }
  0xa7   :  { %v166_v1 = vrot.slane %v165_v57, 1  ;;  %v193_v4 = vadd.f32 %v717_v52, %v192_v58  ;;  %v168_v5 = vrot.slane %v725_v60, 4  ;;  %517 = vpow2.f32 %v158_v63 }
  0xa8   :  { %v730_v9 = vadd.f32 %v178_v61, %v177_v53  ;;  %v181_v10 = vadd.f32 %v719_v56, %v180_v62  ;;  %v743_v21 = vadd.f32 %v190_v6, %v189_v50  ;;  %v755_v31 = vadd.f32 %v339_v16, %v338_v3 }
  0xa9   :  { %v733_v2 = vadd.f32 %v166_v1, %v165_v57  ;;  %v194_v11 = vrot.slane %v193_v4, 2  ;;  %v169_v13 = vadd.f32 %v725_v60, %v168_v5  ;;  %v778_v47 = vmul.f32 %v725_v60, %v687_v12 }
  0xaa   :  { %519 = vrcp.f32 %v730_v9  ;;  %v182_v15 = vrot.slane %v181_v10, 2  ;;  %v251_v41 = vand.u32 2147483648, %v730_v9  ;;  %v785_v49 = vmul.f32 %v719_v56, %v682_v8 }
  0xab   :  { %521 = vrcp.f32 %v733_v2  ;;  %v170_v18 = vrot.slane %v169_v13, 2  ;;  %v195_v23 = vadd.f32 %v194_v11, %v193_v4  ;;  %v221_v7 = vand.u32 2147483648, %v733_v2 }
  0xac   :  { %v745_v22 = vpop.eup %515  ;;  %v183_v24 = vadd.f32 %v182_v15, %v181_v10  ;;  %523 = vrcp.f32 %v743_v21  ;;  %v219_v53 = vand.u32 2147483647, %v733_v2  ;;  %vm215_vm1 = vweird.f32 %v733_v2 }
  0xad   :  { %v171_v25 = vadd.f32 %v170_v18, %v169_v13  ;;  %v204_v26 = vrot.slane %v745_v22, 4  ;;  %v749_v27 = vpop.eup %517  ;;  %v196_v40 = vrot.slane %v195_v23, 1  ;;  %v249_v55 = vand.u32 2147483647, %v730_v9 }
  0xae   :  { %v184_v29 = vrot.slane %v183_v24, 1  ;;  %v198_v35 = vrot.slane %v749_v27, 4  ;;  %v222_v3 = vor.u32 1.1754944e-38, %v221_v7  ;;  %vm245_vm2 = vweird.f32 %v730_v9 }
  0xaf   :  { %v172_v34 = vrot.slane %v171_v25, 1  ;;  %v205_v37 = vadd.f32 %v745_v22, %v204_v26  ;;  %v793_v58 = vadd.f32 %v196_v40, %v195_v23  ;;  %v252_v8 = vor.u32 1.1754944e-38, %v251_v41 }
  0xb0   :  { %v763_v38 = vpop.eup %519  ;;  %v765_v39 = vadd.f32 %v184_v29, %v183_v24  ;;  %v199_v44 = vadd.f32 %v749_v27, %v198_v35  ;;  %vm275_vm3 = vweird.f32 %v743_v21  ;;  %vm799_vm4 = vcmp.eq.f32.partialorder %v219_v53, 8.507059e+37 }
  0xb1   :  { %v769_v42 = vpop.eup %521  ;;  %v771_v43 = vadd.f32 %v172_v34, %v171_v25  ;;  %v206_v45 = vrot.slane %v205_v37, 2  ;;  %v241_v46 = vmul.f32 %v763_v38, %v730_v9  ;;  %vm246_vm6 = vweird.f32 %v763_v38 }
  0xb2   :  { %v211_v48 = vmul.f32 %v769_v42, %v733_v2  ;;  %525 = vrcp.f32 %v765_v39  ;;  %v200_v50 = vrot.slane %v199_v44, 2  ;;  %v791_v57 = vpop.eup %523  ;;  %v264_v10 = vand.u32 2147483647, %v765_v39 }
  0xb3   :  { %527 = vrcp.f32 %v771_v43  ;;  %v207_v51 = vadd.f32 %v206_v45, %v205_v37  ;;  %v242_v12 = vsub.f32 1.0, %v241_v46  ;;  %v236_v63 = vand.u32 2147483648, %v771_v43 }
  0xb4   :  { %v212_v54 = vsub.f32 1.0, %v211_v48  ;;  %v201_v59 = vadd.f32 %v200_v50, %v199_v44  ;;  %v234_v5 = vand.u32 2147483647, %v771_v43  ;;  %vm216_vm5 = vweird.f32 %v769_v42 }
  0xb5   :  { %v208_v61 = vrot.slane %v207_v51, 1  ;;  %v243_v6 = vmul.f32 %v763_v38, %v242_v12  ;;  %v271_v13 = vmul.f32 %v791_v57, %v743_v21  ;;  %v279_v14 = vand.u32 2147483647, %v743_v21  ;;  %vm837_vm12 = vmor %vm215_vm1, %vm216_vm5 }
  0xb6   :  { %v213_v62 = vmul.f32 %v769_v42, %v212_v54  ;;  %v202_v1 = vrot.slane %v201_v59, 1  ;;  %vm230_vm7 = vweird.f32 %v771_v43  ;;  %vm813_vm8 = vcmp.eq.f32.partialorder %v249_v55, 8.507059e+37  ;;  %vm852_vm1 = vmor %vm245_vm2, %vm246_vm6 }
  0xb7   :  { %vm260_vm9 = vweird.f32 %v765_v39  ;;  %v821_v25 = vadd.f32 %v208_v61, %v207_v51  ;;  %v237_v29 = vor.u32 1.1754944e-38, %v236_v63  ;;  %vm824_vm10 = vcmp.eq.f32.partialorder %v234_v5, 8.507059e+37 }
  0xb8   :  { %v526_v11 = vpop.eup %525  ;;  %v214_v16 = vadd.f32 %v769_v42, %v213_v62  ;;  %v819_v24 = vadd.f32 %v202_v1, %v201_v59  ;;  %v244_v35 = vadd.f32 %v763_v38, %v243_v6  ;;  %vm829_vm11 = vcmp.eq.f32.partialorder %v264_v10, 8.507059e+37 }
  0xb9   :  { %v528_v15 = vpop.eup %527  ;;  %v256_v23 = vmul.f32 %v526_v11, %v765_v39  ;;  %v272_v7 = vsub.f32 1.0, %v271_v13  ;;  %v266_v45 = vand.u32 2147483648, %v765_v39  ;;  %vm276_vm13 = vweird.f32 %v791_v57 }
  0xba   :  { %v226_v26 = vmul.f32 %v528_v15, %v771_v43  ;;  %529 = vrcp.f32 %v793_v58  ;;  %v218_v46 = vsel %vm837_vm12, %v769_v42, %v214_v16  ;;  %vm261_vm14 = vweird.f32 %v526_v11  ;;  %vm864_vm5 = vmor %vm275_vm3, %vm276_vm13 }
  0xbb   :  { %v257_v37 = vsub.f32 1.0, %v256_v23  ;;  %v273_v50 = vmul.f32 %v791_v57, %v272_v7  ;;  %vm231_vm15 = vweird.f32 %v528_v15  ;;  %v281_v53 = vand.u32 2147483648, %v743_v21  ;;  %vm875_vm2 = vmor %vm260_vm9, %vm261_vm14 }
  0xbc   :  { %v227_v44 = vsub.f32 1.0, %v226_v26  ;;  %531 = vrcp.f32 %v819_v24  ;;  %v248_v42 = vsel %vm852_vm1, %v763_v38, %v244_v35  ;;  %v296_v9 = vand.u32 2147483648, %v793_v58  ;;  %vm882_vm3 = vmor %vm230_vm7, %vm231_vm15 }
  0xbd   :  { %v258_v48 = vmul.f32 %v526_v11, %v257_v37  ;;  %v274_v12 = vadd.f32 %v791_v57, %v273_v50  ;;  %v871_v59 = vsel %vm799_vm4, %v222_v3, %v218_v46  ;;  %v267_v62 = vor.u32 1.1754944e-38, %v266_v45 }
  0xbe   :  { %v228_v2 = vmul.f32 %v528_v15, %v227_v44  ;;  %v294_v21 = vand.u32 2147483647, %v793_v58  ;;  %v311_v1 = vand.u32 2147483648, %v819_v24  ;;  %533 = vrcp.f32 %v821_v25 }
  0xbf   :  { %v259_v54 = vadd.f32 %v526_v11, %v258_v48  ;;  %v278_v39 = vsel %vm864_vm5, %v791_v57, %v274_v12  ;;  %v897_v43 = vsel %vm813_vm8, %v252_v8, %v248_v42  ;;  %vm280_vm4 = vcmp.eq.f32.partialorder %v279_v14, 8.507059e+37 }
  0xc0   :  { %v229_v61 = vadd.f32 %v528_v15, %v228_v2  ;;  %v530_v4 = vpop.eup %529  ;;  %v282_v6 = vor.u32 1.1754944e-38, %v281_v53  ;;  %vm290_vm6 = vweird.f32 %v793_v58  ;;  %v309_v57 = vand.u32 2147483647, %v819_v24 }
  0xc1   :  { %v263_v3 = vsel %vm875_vm2, %v526_v11, %v259_v54  ;;  %v286_v10 = vmul.f32 %v530_v4, %v793_v58  ;;  %v297_v11 = vor.u32 1.1754944e-38, %v296_v9  ;;  %vm291_vm7 = vweird.f32 %v530_v4 }
  0xc2   :  { %v233_v5 = vsel %vm882_vm3, %v528_v15, %v229_v61  ;;  %v902_v13 = vpop.eup %531  ;;  %v910_v15 = vsel %vm829_vm11, %v267_v62, %v263_v3  ;;  %v912_v8 = vsel %vm280_vm4, %v282_v6, %v278_v39  ;;  %vm305_vm8 = vweird.f32 %v819_v24  ;;  %vm943_vm11 = vmor %vm290_vm6, %vm291_vm7 }
  0xc3   :  { %v906_v16 = vsel %vm824_vm10, %v237_v29, %v233_v5  ;;  %v287_v14 = vsub.f32 1.0, %v286_v10  ;;  %vm915_vm9 = vcmp.eq.f32.partialorder %v294_v21, 8.507059e+37  ;;  %v301_v23 = vmul.f32 %v902_v13, %v819_v24 }
  0xc4   :  { %v921_v26 = vor.u32 1.1754944e-38, %v311_v1  ;;  %v341_v29 = vrot.slane %v755_v31, 2  ;;  %v324_v34 = vand.u32 2147483647, %v821_v25  ;;  %v326_v35 = vand.u32 2147483648, %v821_v25  ;;  %v931_v7 = vpop.eup %533 }
  0xc5   :  { %v345_v37 = vsel %vm65_vm0, %v778_v47, 0.0  ;;  %v354_v40 = vadd.f32 %v353_v0, %v740_v17  ;;  %v288_v41 = vmul.f32 %v530_v4, %v287_v14  ;;  %v302_v44 = vsub.f32 1.0, %v301_v23 }
  0xc6   :  { %v342_v45 = vadd.f32 %v341_v29, %v755_v31  ;;  %v346_v46 = vrot.slane %v345_v37, 4  ;;  %vm306_vm10 = vweird.f32 %v902_v13  ;;  %v316_v48 = vmul.f32 %v931_v7, %v821_v25 }
  0xc7   :  { %v355_v50 = vrot.slane %v354_v40, 2  ;;  %v359_v47 = vsel %vm65_vm0, %v785_v49, 0.0  ;;  %v289_v2 = vadd.f32 %v530_v4, %v288_v41  ;;  %v303_v51 = vmul.f32 %v902_v13, %v302_v44  ;;  %vm961_vm13 = vmor %vm305_vm8, %vm306_vm10 }
  0xc8   :  { %v343_v17 = vrot.slane %v342_v45, 1  ;;  %v347_v0 = vadd.f32 %v346_v46, %v345_v37  ;;  %v317_v53 = vsub.f32 1.0, %v316_v48  ;;  %v360_v54 = vrot.slane %v359_v47, 4 }
  0xc9   :  { %v356_v42 = vadd.f32 %v355_v50, %v354_v40  ;;  %v367_v12 = vrot.slane %v758_v33, 4  ;;  %v293_v49 = vsel %vm943_vm11, %v530_v4, %v289_v2  ;;  %v304_v55 = vadd.f32 %v902_v13, %v303_v51 }
  0xca   :  { %v336_v9 = vmul.f32 %v749_v27, %v697_v20  ;;  %v348_v61 = vrot.slane %v347_v0, 2  ;;  %v318_v58 = vmul.f32 %v931_v7, %v317_v53  ;;  %vm321_vm12 = vweird.f32 %v931_v7 }
  0xcb   :  { %v337_v38 = vmul.f32 %v745_v22, %v695_v19  ;;  %v361_v62 = vadd.f32 %v360_v54, %v359_v47  ;;  %vm320_vm14 = vweird.f32 %v821_v25  ;;  %v357_v63 = vrot.slane %v356_v42, 1 }
  0xcc   :  { %v349_v20 = vadd.f32 %v348_v61, %v347_v0  ;;  %v368_v3 = vadd.f32 %v367_v12, %v758_v33  ;;  %v373_v39 = vsel %vm65_vm0, %v753_v30, 0.0  ;;  %v971_v19 = vsel %vm915_vm9, %v297_v11, %v293_v49  ;;  %vm991_vm2 = vmor %vm320_vm14, %vm321_vm12 }
  0xcd   :  { %v308_v24 = vsel %vm961_vm13, %v902_v13, %v304_v55  ;;  %v344_v1 = vadd.f32 %v343_v17, %v342_v45  ;;  %v362_v4 = vrot.slane %v361_v62, 2  ;;  %v374_v10 = vrot.slane %v373_v39, 4 }
  0xce   :  { %v350_v5 = vrot.slane %v349_v20, 1  ;;  %v369_v6 = vrot.slane %v368_v3, 2  ;;  %v380_v14 = vsel %vm65_vm0, %v336_v9, 0.0  ;;  %vm977_vm15 = vcmp.eq.f32.partialorder %v309_v57, 8.507059e+37 }
  0xcf   :  { %v319_v30 = vadd.f32 %v931_v7, %v318_v58  ;;  %v363_v18 = vadd.f32 %v362_v4, %v361_v62  ;;  %v381_v11 = vrot.slane %v380_v14, 4  ;;  %v387_v23 = vsel %vm65_vm0, %v337_v38, 0.0 }
  0xd0   :  { %v351_v29 = vadd.f32 %v350_v5, %v349_v20  ;;  %v358_v37 = vadd.f32 %v357_v63, %v356_v42  ;;  %v370_v13 = vadd.f32 %v369_v6, %v368_v3  ;;  %v375_v40 = vadd.f32 %v374_v10, %v373_v39 }
  0xd1   :  { %v364_v41 = vrot.slane %v363_v18, 1  ;;  %v382_v44 = vadd.f32 %v381_v11, %v380_v14  ;;  %v388_v45 = vrot.slane %v387_v23, 4  ;;  %v394_v46 = vmul.f32 %v344_v1, %v871_v59 }
  0xd2   :  { %v371_v48 = vrot.slane %v370_v13, 1  ;;  %v376_v57 = vrot.slane %v375_v40, 2  ;;  %v395_v50 = vmul.f32 %v351_v29, %v906_v16  ;;  %v396_v47 = vmul.f32 %v358_v37, %v897_v43 }
  0xd3   :  { %v365_v2 = vadd.f32 %v364_v41, %v363_v18  ;;  %v383_v51 = vrot.slane %v382_v44, 2  ;;  %v389_v17 = vadd.f32 %v388_v45, %v387_v23  ;;  %vm410_vm1 = vcmask 1041409  }
  0xd4   :  { %v372_v0 = vadd.f32 %v371_v48, %v370_v13  ;;  %v377_v31 = vadd.f32 %v376_v57, %v375_v40  ;;  %v411_v53 = vsel %vm410_vm1, %v395_v50, %v394_v46  ;;  %vm412_vm5 = vcmask 1042434  }
  0xd5   :  { %v384_v54 = vadd.f32 %v383_v51, %v382_v44  ;;  %v390_v12 = vrot.slane %v389_v17, 2  ;;  %v397_v49 = vmul.f32 %v365_v2, %v910_v15  ;;  %v413_v55 = vsel %vm412_vm5, %v396_v47, %v411_v53 }
  0xd6   :  { %v323_v9 = vsel %vm991_vm2, %v931_v7, %v319_v30  ;;  %v378_v61 = vrot.slane %v377_v31, 1  ;;  %vm414_vm3 = vcmask 1043459   ;;  %vm416_vm4 = vcmask 1044484  }
  0xd7   :  { %v385_v58 = vrot.slane %v384_v54, 1  ;;  %v391_v38 = vadd.f32 %v390_v12, %v389_v17  ;;  %v398_v62 = vmul.f32 %v372_v0, %v912_v8  ;;  %v415_v21 = vsel %vm414_vm3, %v397_v49, %v413_v55 }
  0xd8   :  { %v313_v20 = vsel %vm977_vm15, %v921_v26, %v308_v24  ;;  %vm325_vm6 = vcmp.eq.f32.partialorder %v324_v34, 8.507059e+37  ;;  %v327_v63 = vor.u32 1.1754944e-38, %v326_v35  ;;  %v379_v7 = vadd.f32 %v378_v61, %v377_v31 }
  0xd9   :  { %v386_v3 = vadd.f32 %v385_v58, %v384_v54  ;;  %v392_v39 = vrot.slane %v391_v38, 1  ;;  %v417_v1 = vsel %vm416_vm4, %v398_v62, %v415_v21  ;;  %vm418_vm7 = vcmask 1045509  }
  0xda   :  { %v328_v4 = vsel %vm325_vm6, %v327_v63, %v323_v9  ;;  %v399_v5 = vmul.f32 %v379_v7, %v971_v19  ;;  %vm420_vm8 = vcmask 1046534   ;;  %vm422_vm9 = vcmask 1047559  }
  0xdb   :  { %v393_v6 = vadd.f32 %v392_v39, %v391_v38  ;;  %v400_v10 = vmul.f32 %v386_v3, %v313_v20  ;;  %v426_v26 = vmul.f32 %v708_v36, %v871_v59  ;;  %v427_v34 = vmul.f32 %v725_v60, %v906_v16 }
  0xdc   :  { %v419_v25 = vsel %vm418_vm7, %v399_v5, %v417_v1  ;;  %v442_v35 = vlaneseq  ;;  %v428_v33 = vmul.f32 %v705_v32, %v897_v43  ;;  %v429_v30 = vmul.f32 %v719_v56, %v910_v15 }
  0xdd   :  { %v401_v24 = vmul.f32 %v393_v6, %v328_v4  ;;  %v421_v14 = vsel %vm420_vm8, %v400_v10, %v419_v25  ;;  %v430_v36 = vmul.f32 %v703_v28, %v912_v8  ;;  %v432_v60 = vmul.f32 %v749_v27, %v313_v20 }
  0xde   :  { %v443_v18 = vand.u32 127, %v442_v35  ;;  %v431_v59 = vmul.f32 %v717_v52, %v971_v19  ;;  %v433_v32 = vmul.f32 %v745_v22, %v328_v4 }
  0xdf   :  { %v423_v11 = vsel %vm422_vm9, %v401_v24, %v421_v14 }
  0xe0   :  { %425 = vst.msk [vmem:[#allocation7] sm:$0xff] %vm65_vm0, %v423_v11  ;;  %v444_v43 = vperm.slane %v426_v26, %v443_v18  ;;  %v445_v16 = vperm.slane %v427_v34, %v443_v18  ;;  %v446_v23 = vperm.slane %v428_v33, %v443_v18  ;;  %v447_v56 = vperm.slane %v429_v30, %v443_v18 }
  0xe1   :  { %472 = dma.vmem_to_hbm [thread:$0]  %s468_s1, 128, %s470_s26, [#allocation4]   ;;  %v448_v29 = vperm.slane %v430_v36, %v443_v18  ;;  %v450_v37 = vperm.slane %v432_v60, %v443_v18  ;;  %v449_v8 = vperm.slane %v431_v59, %v443_v18  ;;  %v451_v27 = vperm.slane %v433_v32, %v443_v18 }
  0xe2   :  { %v452_v15 = vsel %vm410_vm1, %v445_v16, %v444_v43  ;;  %vm460_vm0 = vcmask 64512  }
  0xe3   :  { %v453_v28 = vsel %vm412_vm5, %v446_v23, %v452_v15 }
  0xe4   :  { %v454_v13 = vsel %vm414_vm3, %v447_v56, %v453_v28 }
  0xe5   :  { %v455_v52 = vsel %vm416_vm4, %v448_v29, %v454_v13 }
  0xe6   :  { %v456_v22 = vsel %vm418_vm7, %v449_v8, %v455_v52 }
  0xe7   :  { %v457_v19 = vsel %vm420_vm8, %v450_v37, %v456_v22 }
  0xe8   :  { %v458_v40 = vsel %vm422_vm9, %v451_v27, %v457_v19 }
  0xe9   :  { %461 = vst.msk [vmem:[#allocation8] sm:$0xff] %vm460_vm0, %v458_v40 }
  0xea   :  { %483 = dma.vmem_to_hbm [thread:$0]  %s479_s27, 128, %s481_s30, [#allocation9]  }
  0xeb   :  { %635 = dma.done.wait [#allocation4], 128  }
  0xec   :  { %636 = vsyncadd [#allocation4], 4294967168 }
  0xed   :  { %637 = dma.done.wait [#allocation9], 128  }
  0xee   :  { %638 = vsyncadd [#allocation9], 4294967168 }
  0xef   :  { %492 = vsyncpa [#allocation3], 1 }
  0xf0   :  { %493 = vsyncpa [#allocation6], 1 }
  0xf1   :  { %494 = vsyncpa [#allocation4], 1 }
  0xf2   :  { %495 = vsyncpa [#allocation9], 1 }

</bundles_post_ra>
